<compile_context>
chip_gen: v6e
topology: v6e:2x2x1
jax: 0.10.0
libtpu: 0.0.40
codegen_flags: <defaults>
</compile_context>

<pallas_src>
import jax
import jax.numpy as jnp
from jax import lax
from jax.experimental import pallas as pl
from jax.experimental.pallas import tpu as pltpu

BCE_POS_WEIGHT = 5.0  # matches Seq2SeqLoss(bce_pos_weight=5.0)


def _round_up(x, m):
    return ((x + m - 1) // m) * m


def _seq2seq_loss_kernel(olens_ref,                       # SMEM (B,) int32 (scalar prefetch)
                         after_ref, before_ref, ys_ref,   # VMEM (1, TL, D)   time-tiled
                         logits_ref, labels_ref,          # VMEM (1, R, 128)  row-resident
                         out_ref,                         # VMEM (1, 8, 128)
                         acc_l1_ref):                     # VMEM (1, D) f32 accumulator
    b = pl.program_id(0)
    t = pl.program_id(1)
    nt = pl.num_programs(1)
    TL = after_ref.shape[1]

    olen_b = olens_ref[b]
    t0 = t * TL

    @pl.when(t == 0)
    def _init():
        acc_l1_ref[...] = jnp.zeros_like(acc_l1_ref)

    # Skip tiles that are entirely padding (their contribution is exactly zero).
    @pl.when(t0 < olen_b)
    def _accumulate():
        # non-pad mask for this (batch row, time tile), built directly at tile shape
        tidx = lax.broadcasted_iota(jnp.int32, after_ref.shape, 1) + t0
        valid = tidx < olen_b

        # Fused masked L1 numerators: |after - ys| + |before - ys| (shared denominator).
        ys = ys_ref[...].astype(jnp.float32)
        l1 = jnp.abs(after_ref[...].astype(jnp.float32) - ys)
        l1 = l1 + jnp.abs(before_ref[...].astype(jnp.float32) - ys)
        acc_l1_ref[...] += jnp.sum(jnp.where(valid, l1, 0.0), axis=1)   # time-only reduce -> (1, D)

    @pl.when(t == nt - 1)
    def _finalize():
        # Whole-row pos-weighted BCE-with-logits on the lane-dense view (once per row):
        #   loss = pw * y * softplus(-x) + (1 - y) * (x + softplus(-x))
        x = logits_ref[...].astype(jnp.float32)           # (1, R, 128)
        y = labels_ref[...].astype(jnp.float32)
        row = lax.broadcasted_iota(jnp.int32, x.shape, 1)
        lane = lax.broadcasted_iota(jnp.int32, x.shape, 2)
        valid = (row * 128 + lane) < olen_b
        sp = jnp.logaddexp(0.0, -x)                       # softplus(-x), numerically stable
        bce = BCE_POS_WEIGHT * y * sp + (1.0 - y) * (x + sp)
        bce_sum = jnp.sum(jnp.where(valid, bce, 0.0))

        l1_sum = jnp.sum(acc_l1_ref[...])                 # single cross-lane reduce per row

        rid = lax.broadcasted_iota(jnp.int32, out_ref.shape, 1)
        cid = lax.broadcasted_iota(jnp.int32, out_ref.shape, 2)
        blk = jnp.where((rid == 0) & (cid == 0), l1_sum, 0.0)
        blk = jnp.where((rid == 0) & (cid == 1), bce_sum, blk)
        out_ref[...] = blk                                # lane-dense (8,128) slab


def seq2seq_loss(after_outs, before_outs, logits, ys, labels, olens, *, time_tile=2048):
    """Returns (l1_loss, bce_loss) matching the PyTorch Seq2SeqLoss.forward."""
    B, L, D = ys.shape

    # Time tile: multiple of 128 (lane-aligned), no larger than the padded length.
    tl = min(_round_up(L, 128), _round_up(max(int(time_tile), 128), 128))
    Lpad = _round_up(L, tl)
    pad = Lpad - L
    if pad:
        after_outs = jnp.pad(after_outs, ((0, 0), (0, pad), (0, 0)))
        before_outs = jnp.pad(before_outs, ((0, 0), (0, pad), (0, 0)))
        ys = jnp.pad(ys, ((0, 0), (0, pad), (0, 0)))
        logits = jnp.pad(logits, ((0, 0), (0, pad)))
        labels = jnp.pad(labels, ((0, 0), (0, pad)))

    # Lane-dense whole-row view of the stop-token stream (Lpad is a multiple of 128).
    R = Lpad // 128
    logits3 = logits.reshape(B, R, 128)
    labels3 = labels.reshape(B, R, 128)
    olens_i32 = olens.astype(jnp.int32)

    nt = Lpad // tl
    feat_spec = pl.BlockSpec((1, tl, D), lambda b, t, olens: (b, t, 0))
    # Constant block index along t -> fetched once per batch row, VMEM-resident.
    row_spec = pl.BlockSpec((1, R, 128), lambda b, t, olens: (b, 0, 0))

    grid_spec = pltpu.PrefetchScalarGridSpec(
        num_scalar_prefetch=1,
        grid=(B, nt),
        in_specs=[feat_spec, feat_spec, feat_spec, row_spec, row_spec],
        out_specs=pl.BlockSpec((1, 8, 128), lambda b, t, olens: (b, 0, 0)),
        scratch_shapes=[pltpu.VMEM((1, D), jnp.float32)],   # fused L1 accumulator
    )

    partial = pl.pallas_call(
        _seq2seq_loss_kernel,
        out_shape=jax.ShapeDtypeStruct((B, 8, 128), jnp.float32),
        grid_spec=grid_spec,
        compiler_params=pltpu.CompilerParams(
            dimension_semantics=("parallel", "arbitrary"),
            vmem_limit_bytes=32 * 1024 * 1024),
    )(olens_i32, after_outs, before_outs, ys, logits3, labels3)

    # masked_select counts (undefined if all olens == 0, same as the reference).
    n_frames = jnp.sum(olens_i32).astype(jnp.float32)
    n_feat = n_frames * D
    l1_loss = jnp.sum(partial[:, 0, 0]) / n_feat      # (sum_a + sum_b)/N == sum_a/N + sum_b/N
    bce_loss = jnp.sum(partial[:, 0, 1]) / n_frames
    return l1_loss, bce_loss


def _reference(after_outs, before_outs, logits, ys, labels, olens):
    """Pure-JAX reference of the PyTorch module for verification."""
    B, L, D = ys.shape
    mask = (jnp.arange(L)[None, :] < olens[:, None]).astype(jnp.float32)
    m3 = mask[:, :, None]
    n = jnp.sum(mask)
    l1 = (jnp.sum(jnp.abs(after_outs - ys) * m3) / (n * D)
          + jnp.sum(jnp.abs(before_outs - ys) * m3) / (n * D))
    x = logits
    y = labels.astype(jnp.float32)
    sp = jnp.logaddexp(0.0, -x)
    bce = BCE_POS_WEIGHT * y * sp + (1.0 - y) * (x + sp)
    bce = jnp.sum(bce * mask) / n
    return l1, bce


if __name__ == "__main__":
    key = jax.random.PRNGKey(0)
    B, L, D = 2, 300, 80           # small but realistic seq2seq-VC shapes
    k1, k2, k3, k4 = jax.random.split(key, 4)

    ys = jax.random.normal(k1, (B, L, D), dtype=jnp.float32)
    after_outs = ys + 0.1 * jax.random.normal(k2, (B, L, D), dtype=jnp.float32)
    before_outs = ys + 0.3 * jax.random.normal(k3, (B, L, D), dtype=jnp.float32)
    logits = jax.random.normal(k4, (B, L), dtype=jnp.float32)

    olens = jnp.array([300, 187], dtype=jnp.int32)
    # stop-token labels: 1 at and after the last valid frame, 0 elsewhere
    labels = (jnp.arange(L)[None, :] >= (olens[:, None] - 1)).astype(jnp.int32)

    # time_tile=128 -> Lpad=384, 3 time tiles per row: exercises multi-tile
    # accumulation, the padded-tile skip path, and the parallel batch axis.
    l1_loss, bce_loss = seq2seq_loss(after_outs, before_outs, logits, ys,
                                     labels, olens, time_tile=128)
    jax.block_until_ready((l1_loss, bce_loss))

    l1_ref, bce_ref = _reference(after_outs, before_outs, logits, ys,
                                 labels, olens)
    assert jnp.allclose(l1_loss, l1_ref, rtol=1e-4, atol=1e-5), (l1_loss, l1_ref)
    assert jnp.allclose(bce_loss, bce_ref, rtol=1e-4, atol=1e-5), (bce_loss, bce_ref)

    print("KERNEL_OK")
</pallas_src>

<mosaic_0001>
module attributes {stable_mosaic.version = 11 : i64} {
  func.func @_seq2seq_loss_kernel(%arg0: i32, %arg1: i32, %arg2: memref<2xi32, #tpu.memory_space<smem>>, %arg3: memref<1x128x80xf32, #tpu.memory_space<vmem>>, %arg4: memref<1x128x80xf32, #tpu.memory_space<vmem>>, %arg5: memref<1x128x80xf32, #tpu.memory_space<vmem>>, %arg6: memref<1x3x128xf32, #tpu.memory_space<vmem>>, %arg7: memref<1x3x128xi32, #tpu.memory_space<vmem>>, %arg8: memref<1x8x128xf32, #tpu.memory_space<vmem>>, %arg9: memref<1x80xf32, #tpu.memory_space<vmem>>) attributes {dimension_semantics = [#tpu.dimension_semantics<parallel>, #tpu.dimension_semantics<arbitrary>], iteration_bounds = array<i64: 2, 3>, scalar_prefetch = 1 : i64, scratch_operands = 1 : i64, tpu.core_type = #tpu.core_type<tc>, window_params = [{transform_indices = @transform_0, window_bounds = array<i64: 1, 128, 80>}, {transform_indices = @transform_1, window_bounds = array<i64: 1, 128, 80>}, {transform_indices = @transform_2, window_bounds = array<i64: 1, 128, 80>}, {transform_indices = @transform_3, window_bounds = array<i64: 1, 3, 128>}, {transform_indices = @transform_4, window_bounds = array<i64: 1, 3, 128>}, {transform_indices = @transform_5, window_bounds = array<i64: 1, 8, 128>}]} {
    %0 = arith.index_cast %arg0 : i32 to index
    %1 = memref.load %arg2[%0] : memref<2xi32, #tpu.memory_space<smem>>
    %c128_i32 = arith.constant 128 : i32
    %2 = arith.muli %arg1, %c128_i32 : i32
    %c0_i32 = arith.constant 0 : i32
    %3 = arith.cmpi eq, %arg1, %c0_i32 : i32
    %4 = arith.extui %3 : i1 to i32
    %c0_i32_0 = arith.constant 0 : i32
    %5 = arith.cmpi ne, %4, %c0_i32_0 : i32
    scf.if %5 {
      %cst = arith.constant 0.000000e+00 : f32
      %12 = vector.broadcast %cst : f32 to vector<1x80xf32>
      %c0 = arith.constant 0 : index
      %c0_3 = arith.constant 0 : index
      %13 = vector.load %arg9[%c0, %c0_3] : memref<1x80xf32, #tpu.memory_space<vmem>>, vector<1x80xf32>
      tpu.vector_store %arg9[%c0, %c0_3], %12 {strides = array<i32>} : memref<1x80xf32, #tpu.memory_space<vmem>>, vector<1x80xf32>,
    } else {
    }
    %6 = arith.cmpi slt, %2, %1 : i32
    %7 = arith.extui %6 : i1 to i32
    %c0_i32_1 = arith.constant 0 : i32
    %8 = arith.cmpi ne, %7, %c0_i32_1 : i32
    scf.if %8 {
      %12 = tpu.iota {dimensions = array<i32: 1>} : vector<1x128x80xi32>
      %13 = vector.broadcast %2 : i32 to vector<1x128x80xi32>
      %14 = arith.addi %12, %13 : vector<1x128x80xi32>
      %15 = vector.broadcast %1 : i32 to vector<1x128x80xi32>
      %16 = arith.cmpi slt, %14, %15 : vector<1x128x80xi32>
      %c0 = arith.constant 0 : index
      %c0_3 = arith.constant 0 : index
      %c0_4 = arith.constant 0 : index
      %17 = vector.load %arg5[%c0, %c0_3, %c0_4] : memref<1x128x80xf32, #tpu.memory_space<vmem>>, vector<1x128x80xf32>
      %c0_5 = arith.constant 0 : index
      %c0_6 = arith.constant 0 : index
      %c0_7 = arith.constant 0 : index
      %18 = vector.load %arg3[%c0_5, %c0_6, %c0_7] : memref<1x128x80xf32, #tpu.memory_space<vmem>>, vector<1x128x80xf32>
      %19 = arith.subf %18, %17 : vector<1x128x80xf32>
      %20 = math.absf %19 : vector<1x128x80xf32>
      %c0_8 = arith.constant 0 : index
      %c0_9 = arith.constant 0 : index
      %c0_10 = arith.constant 0 : index
      %21 = vector.load %arg4[%c0_8, %c0_9, %c0_10] : memref<1x128x80xf32, #tpu.memory_space<vmem>>, vector<1x128x80xf32>
      %22 = arith.subf %21, %17 : vector<1x128x80xf32>
      %23 = math.absf %22 : vector<1x128x80xf32>
      %24 = arith.addf %20, %23 : vector<1x128x80xf32>
      %c0_11 = arith.constant 0 : index
      %c0_12 = arith.constant 0 : index
      %25 = vector.load %arg9[%c0_11, %c0_12] : memref<1x80xf32, #tpu.memory_space<vmem>>, vector<1x80xf32>
      %cst = arith.constant 0.000000e+00 : f32
      %26 = vector.broadcast %cst : f32 to vector<1x128x80xf32>
      %27 = arith.select %16, %24, %26 : vector<1x128x80xi1>, vector<1x128x80xf32>
      %cst_13 = arith.constant dense<0.000000e+00> : vector<1x80xf32>
      %28 = vector.multi_reduction <add>, %27, %cst_13 [1] : vector<1x128x80xf32> to vector<1x80xf32>
      %29 = arith.addf %25, %28 : vector<1x80xf32>
      %c0_14 = arith.constant 0 : index
      %c0_15 = arith.constant 0 : index
      %30 = vector.load %arg9[%c0_14, %c0_15] : memref<1x80xf32, #tpu.memory_space<vmem>>, vector<1x80xf32>
      tpu.vector_store %arg9[%c0_14, %c0_15], %29 {strides = array<i32>} : memref<1x80xf32, #tpu.memory_space<vmem>>, vector<1x80xf32>,
    } else {
    }
    %c2_i32 = arith.constant 2 : i32
    %9 = arith.cmpi eq, %arg1, %c2_i32 : i32
    %10 = arith.extui %9 : i1 to i32
    %c0_i32_2 = arith.constant 0 : i32
    %11 = arith.cmpi ne, %10, %c0_i32_2 : i32
    scf.if %11 {
      %c0 = arith.constant 0 : index
      %c0_3 = arith.constant 0 : index
      %c0_4 = arith.constant 0 : index
      %12 = vector.load %arg6[%c0, %c0_3, %c0_4] : memref<1x3x128xf32, #tpu.memory_space<vmem>>, vector<1x3x128xf32>
      %c0_5 = arith.constant 0 : index
      %c0_6 = arith.constant 0 : index
      %c0_7 = arith.constant 0 : index
      %13 = vector.load %arg7[%c0_5, %c0_6, %c0_7] : memref<1x3x128xi32, #tpu.memory_space<vmem>>, vector<1x3x128xi32>
      %14 = arith.sitofp %13 : vector<1x3x128xi32> to vector<1x3x128xf32>
      %15 = tpu.iota {dimensions = array<i32: 1>} : vector<1x3x128xi32>
      %16 = tpu.iota {dimensions = array<i32: 2>} : vector<1x3x128xi32>
      %c128_i32_8 = arith.constant 128 : i32
      %17 = vector.broadcast %c128_i32_8 : i32 to vector<1x3x128xi32>
      %18 = arith.muli %15, %17 : vector<1x3x128xi32>
      %19 = arith.addi %18, %16 : vector<1x3x128xi32>
      %20 = vector.broadcast %1 : i32 to vector<1x3x128xi32>
      %21 = arith.cmpi slt, %19, %20 : vector<1x3x128xi32>
      %cst = arith.constant 0.000000e+00 : f32
      %22 = vector.broadcast %cst : f32 to vector<1x3x128xf32>
      %23 = arith.subf %22, %12 : vector<1x3x128xf32>
      %cst_9 = arith.constant 0.000000e+00 : f32
      %24 = vector.broadcast %cst_9 : f32 to vector<1x3x128xf32>
      %25 = arith.maximumf %24, %23 : vector<1x3x128xf32>
      %26 = vector.broadcast %cst_9 : f32 to vector<1x3x128xf32>
      %27 = arith.subf %26, %23 : vector<1x3x128xf32>
      %28 = arith.cmpf one, %27, %27 : vector<1x3x128xf32>
      %29 = vector.broadcast %cst_9 : f32 to vector<1x3x128xf32>
      %30 = arith.addf %29, %23 : vector<1x3x128xf32>
      %31 = math.absf %27 : vector<1x3x128xf32>
      %cst_10 = arith.constant 0.000000e+00 : f32
      %32 = vector.broadcast %cst_10 : f32 to vector<1x3x128xf32>
      %33 = arith.subf %32, %31 : vector<1x3x128xf32>
      %34 = math.exp %33 : vector<1x3x128xf32>
      %35 = math.log1p %34 : vector<1x3x128xf32>
      %36 = arith.addf %25, %35 : vector<1x3x128xf32>
      %37 = arith.select %28, %30, %36 : vector<1x3x128xi1>, vector<1x3x128xf32>
      %cst_11 = arith.constant 5.000000e+00 : f32
      %38 = vector.broadcast %cst_11 : f32 to vector<1x3x128xf32>
      %39 = arith.mulf %38, %14 : vector<1x3x128xf32>
      %40 = arith.mulf %39, %37 : vector<1x3x128xf32>
      %cst_12 = arith.constant 1.000000e+00 : f32
      %41 = vector.broadcast %cst_12 : f32 to vector<1x3x128xf32>
      %42 = arith.subf %41, %14 : vector<1x3x128xf32>
      %43 = arith.addf %12, %37 : vector<1x3x128xf32>
      %44 = arith.mulf %42, %43 : vector<1x3x128xf32>
      %45 = arith.addf %40, %44 : vector<1x3x128xf32>
      %cst_13 = arith.constant 0.000000e+00 : f32
      %46 = vector.broadcast %cst_13 : f32 to vector<1x3x128xf32>
      %47 = arith.select %21, %45, %46 : vector<1x3x128xi1>, vector<1x3x128xf32>
      %48 = vector.shape_cast %47 : vector<1x3x128xf32> to vector<1x1x3x128xf32>
      %cst_14 = arith.constant dense<0.000000e+00> : vector<1xf32>
      %49 = vector.multi_reduction <add>, %48, %cst_14 [1, 2, 3] : vector<1x1x3x128xf32> to vector<1xf32>
      %50 = vector.shape_cast %49 : vector<1xf32> to vector<1x1x1x1xf32>
      %51 = vector.extract %50[0, 0, 0, 0] : f32 from vector<1x1x1x1xf32>
      %c0_15 = arith.constant 0 : index
      %c0_16 = arith.constant 0 : index
      %52 = vector.load %arg9[%c0_15, %c0_16] : memref<1x80xf32, #tpu.memory_space<vmem>>, vector<1x80xf32>
      %53 = vector.shape_cast %52 : vector<1x80xf32> to vector<1x1x80xf32>
      %cst_17 = arith.constant dense<0.000000e+00> : vector<1xf32>
      %54 = vector.multi_reduction <add>, %53, %cst_17 [1, 2] : vector<1x1x80xf32> to vector<1xf32>
      %55 = vector.shape_cast %54 : vector<1xf32> to vector<1x1x1xf32>
      %56 = vector.extract %55[0, 0, 0] : f32 from vector<1x1x1xf32>
      %57 = tpu.iota {dimensions = array<i32: 1>} : vector<1x8x128xi32>
      %58 = tpu.iota {dimensions = array<i32: 2>} : vector<1x8x128xi32>
      %c0_i32_18 = arith.constant 0 : i32
      %59 = vector.broadcast %c0_i32_18 : i32 to vector<1x8x128xi32>
      %60 = arith.cmpi eq, %57, %59 : vector<1x8x128xi32>
      %c0_i32_19 = arith.constant 0 : i32
      %61 = vector.broadcast %c0_i32_19 : i32 to vector<1x8x128xi32>
      %62 = arith.cmpi eq, %58, %61 : vector<1x8x128xi32>
      %63 = arith.andi %60, %62 : vector<1x8x128xi1>
      %cst_20 = arith.constant 0.000000e+00 : f32
      %64 = vector.broadcast %56 : f32 to vector<1x8x128xf32>
      %65 = vector.broadcast %cst_20 : f32 to vector<1x8x128xf32>
      %66 = arith.select %63, %64, %65 : vector<1x8x128xi1>, vector<1x8x128xf32>
      %c0_i32_21 = arith.constant 0 : i32
      %67 = vector.broadcast %c0_i32_21 : i32 to vector<1x8x128xi32>
      %68 = arith.cmpi eq, %57, %67 : vector<1x8x128xi32>
      %c1_i32 = arith.constant 1 : i32
      %69 = vector.broadcast %c1_i32 : i32 to vector<1x8x128xi32>
      %70 = arith.cmpi eq, %58, %69 : vector<1x8x128xi32>
      %71 = arith.andi %68, %70 : vector<1x8x128xi1>
      %72 = vector.broadcast %51 : f32 to vector<1x8x128xf32>
      %73 = arith.select %71, %72, %66 : vector<1x8x128xi1>, vector<1x8x128xf32>
      %c0_22 = arith.constant 0 : index
      %c0_23 = arith.constant 0 : index
      %c0_24 = arith.constant 0 : index
      %74 = vector.load %arg8[%c0_22, %c0_23, %c0_24] : memref<1x8x128xf32, #tpu.memory_space<vmem>>, vector<1x8x128xf32>
      tpu.vector_store %arg8[%c0_22, %c0_23, %c0_24], %73 {strides = array<i32>} : memref<1x8x128xf32, #tpu.memory_space<vmem>>, vector<1x8x128xf32>,
    } else {
    }
    return
  }
  func.func @transform_0(%arg0: i32, %arg1: i32, %arg2: memref<2xi32, #tpu.memory_space<smem>>) -> (i32, i32, i32) {
    %c0_i32 = arith.constant 0 : i32
    %c0_i32_0 = arith.constant 0 : i32
    return %arg0, %arg1, %c0_i32 : i32, i32, i32
  }
  func.func @transform_1(%arg0: i32, %arg1: i32, %arg2: memref<2xi32, #tpu.memory_space<smem>>) -> (i32, i32, i32) {
    %c0_i32 = arith.constant 0 : i32
    %c0_i32_0 = arith.constant 0 : i32
    return %arg0, %arg1, %c0_i32 : i32, i32, i32
  }
  func.func @transform_2(%arg0: i32, %arg1: i32, %arg2: memref<2xi32, #tpu.memory_space<smem>>) -> (i32, i32, i32) {
    %c0_i32 = arith.constant 0 : i32
    %c0_i32_0 = arith.constant 0 : i32
    return %arg0, %arg1, %c0_i32 : i32, i32, i32
  }
  func.func @transform_3(%arg0: i32, %arg1: i32, %arg2: memref<2xi32, #tpu.memory_space<smem>>) -> (i32, i32, i32) {
    %c0_i32 = arith.constant 0 : i32
    %c0_i32_0 = arith.constant 0 : i32
    %c0_i32_1 = arith.constant 0 : i32
    return %arg0, %c0_i32, %c0_i32_0 : i32, i32, i32
  }
  func.func @transform_4(%arg0: i32, %arg1: i32, %arg2: memref<2xi32, #tpu.memory_space<smem>>) -> (i32, i32, i32) {
    %c0_i32 = arith.constant 0 : i32
    %c0_i32_0 = arith.constant 0 : i32
    %c0_i32_1 = arith.constant 0 : i32
    return %arg0, %c0_i32, %c0_i32_0 : i32, i32, i32
  }
  func.func @transform_5(%arg0: i32, %arg1: i32, %arg2: memref<2xi32, #tpu.memory_space<smem>>) -> (i32, i32, i32) {
    %c0_i32 = arith.constant 0 : i32
    %c0_i32_0 = arith.constant 0 : i32
    %c0_i32_1 = arith.constant 0 : i32
    return %arg0, %c0_i32, %c0_i32_0 : i32, i32, i32
  }
}

</mosaic_0001>

<bundles_post_ra>
// kernel: tpu_custom_call.1
= control target key start
LH: loop header
LB: loop body
LE: loop exit
PB: predicated region body
PF: predicated region fallthrough
CT: control target
= control target key end

     0   :  { %s1436_s0 = inlined_call_operand.vmem [shape: s32[2], index: 0, kind: input, shape index: {}]   ;;  %s1437_s1 = inlined_call_operand.vmem [shape: f32[2,384,80], index: 1, kind: input, shape index: {}]   ;;  %s1438_s2 = inlined_call_operand.vmem [shape: f32[2,384,80], index: 2, kind: input, shape index: {}]   ;;  %s1439_s3 = inlined_call_operand.vmem [shape: f32[2,384,80], index: 3, kind: input, shape index: {}]   ;;  %s1440_s4 = inlined_call_operand.vmem [shape: f32[2,3,128], index: 4, kind: input, shape index: {}]   ;;  %s1441_s5 = inlined_call_operand.vmem [shape: s32[2,3,128], index: 5, kind: input, shape index: {}]   ;;  %s1442_s6 = inlined_call_operand.hbm [shape: f32[2,8,128], index: 6, kind: output, shape index: {}]  }
   0x1   :  { %1449 = sst [smem:[#allocation16_spill]] %s1440_s4  ;;  %s11_s23 = sshll.u32 %s1436_s0, 4  ;;  %s12_s23 = int_to_ptr.vmem [resolvable:$true] %s11_s23 }
   0x2   :  { %s942_s24 = scalar_lea.vmem %s12_s23, 16  ;;  %p947_p1 = scmp.lt.s32.totalorder %s12_s23, %s12_s23 }
   0x3   :  { %p943_p0 = scmp.ne.s32.totalorder %s12_s23, %s942_s24  ;;  %p948_p2 = scmp.lt.s32.totalorder %s942_s24, %s942_s24 }
   0x5   :  { %p949_p3 = por %p948_p2, %p947_p1 }
   0x7   :  { %p950_p4 = pnand %p949_p3, %p943_p0 }
   0x9   :  { %953 = shalt.err (!%p950_p4)  }
   0xa   :  { %s1050_s25 = smov [#allocation4]  }
   0xb   :  { %14 = dma.vmem_to_smem %s12_s23, 16, %s1050_s25, [#allocation3] }
   0xc   :  { %1012 = dma.done.wait [#allocation3], 16 }
   0xd   :  { %1013 = vsyncadd [#allocation3], 4294967280 }
   0xe   :  { %16 = sfence }
   0xf   :  { %17 = vsyncpa [#allocation6], 0 }
  0x10   :  { %19 = vsyncpa [#allocation6 + $0x1], 0  ;;  %s1091_s26 = smov 0   ;;  %s1093_s27 = smov 0  }
  0x11   :  { %s1095_s0 = smov 0   ;;  %s1097_s28 = smov 0  }
  0x12   :  { %s1099_s29 = smov 0   ;;  %s1101_s30 = smov 0  }
  0x13   :  { %s1103_s7 = smov 0   ;;  %s1105_s8 = smov 0  }
  0x14 LB: > { %1450 = sst [smem:[#allocation9_spill]] %s1028_s0  ;;  %s838_s9 = sadd.s32 4294967295, %s1048_s8   ;;  %s1048_s8 = sphi %s1105_s8, %s25_s8   ;;  %s1044_s7 = sphi %s1103_s7, %s1467_s7   ;;  %s1040_s30 = sphi %s1101_s30, %s1466_s30   ;;  %s1036_s29 = sphi %s1099_s29, %s1465_s29   ;;  %s1032_s28 = sphi %s1097_s28, %s1464_s28   ;;  %s1028_s0 = sphi %s1095_s0, %s1463_s0   ;;  %s1024_s27 = sphi %s1093_s27, %s1469_s27   ;;  %s1020_s26 = sphi %s1091_s26, %s1468_s26  }
  0x15   : > { %1451 = sst [smem:[#allocation10_spill]] %s1040_s30  ;;  %s839_s10 = sadd.s32 4294967294, %s1048_s8  }
  0x16   : > { %1452 = sst [smem:[#allocation11_spill]] %s1044_s7  ;;  %s34_s11 = sadd.s32 1, %s1040_s30 }
  0x17   : > { %p35_p5 = scmp.ge.s32.totalorder %s34_s11, 3  ;;  %s37_s12 = sadd.s32 1, %s1044_s7 }
  0x18   : > { %p190_p6 = scmp.ne.s32.totalorder %s1028_s0, %s1024_s27  ;;  %p191_p7 = scmp.eq.s32.totalorder %s838_s9, 5 }
  0x19   : > { %s1471_s11 = smov (%p35_p5, %s34_s11), 0  ;;  %s1473_s12 = smov (!%p35_p5, %s37_s12), %s1044_s7 }
  0x1a   : > { %1453 = sst [smem:[#allocation12_spill]] %s1471_s11  ;;  %p1140_p8 = por %p191_p7, %p190_p6 }
  0x1b   : > { %p196_p9 = scmp.ne.s32.totalorder %s1024_s27, %s1020_s26  ;;  %p39_p10 = scmp.ge.s32.totalorder %s1473_s12, 2 }
  0x1c   : > { %p197_p11 = scmp.eq.s32.totalorder %s839_s10, 5  ;;  %p842_p12 = scmp.ge.s32.totalorder %s1048_s8, 1 }
  0x1d   : > { %p268_p13 = scmp.lt.s32.totalorder %s1048_s8, 7  ;;  %s1475_s12 = smov (%p39_p10, %s1473_s12), 0 }
  0x1e   : > { %1455 = sst [smem:[#allocation13_spill]] %s1475_s12  ;;  %p1150_p0 = por %p197_p11, %p196_p9 }
  0x1f   : > { %p269_p1 = pnand %p842_p12, %p268_p13  ;;  %s177_s15 = ssub.s32 %s1044_s7, %s1475_s12 }
  0x20   : > { %s1456_s14 = scalar_select %p1150_p0, 1, 0 }
  0x21   : > { %s180_s16 = sadd.s32 1, %s1028_s0  ;;  %p178_p2 = scmp.eq.s32.totalorder %s177_s15, 0 }
  0x22   : > { %1457 = sst [smem:[#allocation14_spill]] %s1456_s14  ;;  %272 = sbr.rel (%p269_p1) target bundleno = 426 (0x1aa), region = 40 }
  0x23   : > { %s1158_s17 = scalar_select %p178_p2, %s1028_s0, %s180_s16  }
  0x24   : > { %s1444_s18 = sand.u32 (!%p269_p1), 1, %s1024_s27   ;;  %s844_s19 = sshll.u32 (!%p269_p1), %s1032_s28, 4 }
  0x25   : > { %1458 = sst [smem:[#allocation15_spill]] %s1158_s17  ;;  %s1164_s20 = sshll.u32 (!%p269_p1), %s1444_s18, 3 }
  0x26   : > { %p327_p3 = scmp.lt.s32.totalorder (!%p269_p1), %s1036_s29, 1  ;;  %p329_p4 = scmp.lt.s32.totalorder (!%p269_p1), %s844_s19, 47 }
  0x27   : > { %s1459_s4 = sld [smem:[#allocation16_spill]]  ;;  %s852_s7 = sshll.u32 %s1032_s28, 7 }
  0x28   : > { %s328_s21 = scalar_select %p327_p3, %s1036_s29, 1 }
  0x29   : > { %s1477_s19 = smov (!%p329_p4, %s844_s19), 47  ;;  %s1179_s18 = sld [smem:[#allocation4 + %s1036_s29]] }
  0x2a   : > { %s860_s22 = smul.u32 48, %s328_s21  ;;  %s850_s23 = sshll.u32 %s328_s21, 2 }
  0x2b   : > { %s1176_s16 = scalar_lea.vmem %s1441_s5, %s850_s23  ;;  %p853_p5 = scmp.ne.s32.totalorder %s1032_s28, 0 }
  0x2c   : > { %s332_s12 = sadd.s32 %s860_s22, %s1477_s19  ;;  %s325_s19 = scalar_lea.vmem [#allocation5], %s1164_s20 }
  0x2d   : > { %s1171_s9 = scalar_lea.vmem %s1459_s4, %s850_s23  ;;  %s845_s11 = sshll.u32 %s332_s12, 3 }
  0x2e   : > { %s1185_s0 = scalar_lea.vmem %s1437_s1, %s845_s11  ;;  %s1190_s24 = scalar_lea.vmem %s1438_s2, %s845_s11 }
  0x2f   : > { %s1195_s23 = scalar_lea.vmem %s1439_s3, %s845_s11  ;;  %369 = sbr.rel (%p853_p5) target bundleno = 54 (0x36), region = 44 }
  0x34   : > { %vm370_vm0 = vcmask 647168   ;;  %v1051_v0 = vmov 0.0  }
  0x35   : > { %371 = vst.msk [vmem:[#allocation2] sm:$0x1] %vm370_vm0, %v1051_v0 }
  0x36 PF: > { %p854_p6 = scmp.ge.s32.totalorder %s852_s7, %s1179_s18 }
  0x38   : > { %375 = sbr.rel (%p854_p6) target bundleno = 132 (0x84), region = 48 }
  0x3d   : > { %v376_v1 = vlaneseq  ;;  %v1200_v4 = vstv %s852_s7  ;;  %v427_v9 = vld [vmem:[%s1195_s23] sm:$0xff]  ;;  %v428_v14 = vld [vmem:[%s1195_s23 + $0x8] sm:$0xff]  ;;  %v429_v15 = vld [vmem:[%s1195_s23 + $0x10] sm:$0xff]  ;;  %vm572_vm1 = vcmask 654336  }
  0x3e   : > { %v1206_v19 = vstv %s1179_s18  ;;  %v443_v20 = vld [vmem:[%s1185_s0] sm:$0xff]  ;;  %v444_v21 = vld [vmem:[%s1185_s0 + $0x8] sm:$0xff]  ;;  %v445_v22 = vld [vmem:[%s1185_s0 + $0x10] sm:$0xff] }
  0x3f   : > { %v377_v2 = vshrl.u32 %v376_v1, 7  ;;  %v491_v27 = vld [vmem:[%s1190_s24] sm:$0xff]  ;;  %v492_v28 = vld [vmem:[%s1190_s24 + $0x8] sm:$0xff]  ;;  %v493_v29 = vld [vmem:[%s1190_s24 + $0x10] sm:$0xff]  ;;  %v459_v37 = vsub.f32 %v443_v20, %v427_v9  ;;  %v460_v38 = vsub.f32 %v444_v21, %v428_v14  ;;  %v461_v39 = vsub.f32 %v445_v22, %v429_v15 }
  0x40   : > { %v430_v35 = vld [vmem:[%s1195_s23 + $0x18] sm:$0xff]  ;;  %v431_v42 = vld [vmem:[%s1195_s23 + $0x20] sm:$0xff]  ;;  %v507_v44 = vsub.f32 %v491_v27, %v427_v9  ;;  %v508_v45 = vsub.f32 %v492_v28, %v428_v14  ;;  %v509_v46 = vsub.f32 %v493_v29, %v429_v15  ;;  %v432_v51 = vld [vmem:[%s1195_s23 + $0x28] sm:$0xff] }
  0x41   : > { %v378_v3 = vadd.s32 8, %v377_v2  ;;  %v379_v5 = vadd.s32 16, %v377_v2  ;;  %v380_v6 = vadd.s32 24, %v377_v2  ;;  %v381_v7 = vadd.s32 32, %v377_v2  ;;  %v446_v36 = vld [vmem:[%s1185_s0 + $0x18] sm:$0xff]  ;;  %v447_v43 = vld [vmem:[%s1185_s0 + $0x20] sm:$0xff] }
  0x42   : > { %v382_v8 = vadd.s32 40, %v377_v2  ;;  %v383_v10 = vadd.s32 48, %v377_v2  ;;  %v384_v11 = vadd.s32 56, %v377_v2  ;;  %v385_v12 = vadd.s32 64, %v377_v2  ;;  %v494_v40 = vld [vmem:[%s1190_s24 + $0x18] sm:$0xff]  ;;  %v448_v52 = vld [vmem:[%s1185_s0 + $0x28] sm:$0xff] }
  0x43   : > { %v386_v13 = vadd.s32 72, %v377_v2  ;;  %v387_v16 = vadd.s32 80, %v377_v2  ;;  %v388_v17 = vadd.s32 88, %v377_v2  ;;  %v389_v18 = vadd.s32 96, %v377_v2  ;;  %v495_v53 = vld [vmem:[%s1190_s24 + $0x20] sm:$0xff]  ;;  %v433_v56 = vld [vmem:[%s1195_s23 + $0x30] sm:$0xff] }
  0x44   : > { %v1211_v23 = vadd.s32 104, %v377_v2  ;;  %v1213_v24 = vadd.s32 112, %v377_v2  ;;  %v1215_v25 = vadd.s32 120, %v377_v2  ;;  %v1218_v26 = vadd.s32 %v1200_v4, %v377_v2  ;;  %v449_v57 = vld [vmem:[%s1185_s0 + $0x30] sm:$0xff]  ;;  %v496_v59 = vld [vmem:[%s1190_s24 + $0x28] sm:$0xff]  ;;  %v450_v9 = vld [vmem:[%s1185_s0 + $0x38] sm:$0xff] }
  0x45   : > { %v1224_v30 = vadd.s32 %v1200_v4, %v378_v3  ;;  %v1227_v31 = vadd.s32 %v1200_v4, %v379_v5  ;;  %v1230_v32 = vadd.s32 %v1200_v4, %v380_v6  ;;  %v1233_v33 = vadd.s32 %v1200_v4, %v381_v7  ;;  %v497_v60 = vld [vmem:[%s1190_s24 + $0x30] sm:$0xff]  ;;  %v434_v7 = vld [vmem:[%s1195_s23 + $0x38] sm:$0xff]  ;;  %v499_v20 = vld [vmem:[%s1190_s24 + $0x40] sm:$0xff] }
  0x46   : > { %v1236_v34 = vadd.s32 %v1200_v4, %v382_v8  ;;  %v1242_v41 = vadd.s32 %v1200_v4, %v383_v10  ;;  %v1247_v47 = vadd.s32 %v1200_v4, %v384_v11  ;;  %v1250_v48 = vadd.s32 %v1200_v4, %v385_v12  ;;  %v435_v8 = vld [vmem:[%s1195_s23 + $0x40] sm:$0xff]  ;;  %v436_v29 = vld [vmem:[%s1195_s23 + $0x48] sm:$0xff] }
  0x47   : > { %v1253_v49 = vadd.s32 %v1200_v4, %v386_v13  ;;  %v1256_v50 = vadd.s32 %v1200_v4, %v387_v16  ;;  %v1262_v54 = vadd.s32 %v1200_v4, %v388_v17  ;;  %v1265_v55 = vadd.s32 %v1200_v4, %v389_v18  ;;  %v451_v10 = vld [vmem:[%s1185_s0 + $0x40] sm:$0xff]  ;;  %v498_v17 = vld [vmem:[%s1190_s24 + $0x38] sm:$0xff] }
  0x48   : > { %v462_v58 = vsub.f32 %v446_v36, %v430_v35  ;;  %v510_v61 = vsub.f32 %v494_v40, %v430_v35  ;;  %v463_v62 = vsub.f32 %v447_v43, %v431_v42  ;;  %v475_v63 = vand.u32 2147483647, %v459_v37  ;;  %v437_v35 = vld [vmem:[%s1195_s23 + $0x50] sm:$0xff] }
  0x49   : > { %v476_v0 = vand.u32 2147483647, %v460_v38  ;;  %v477_v1 = vand.u32 2147483647, %v461_v39  ;;  %v511_v2 = vsub.f32 %v495_v53, %v431_v42  ;;  %v523_v3 = vand.u32 2147483647, %v507_v44 }
  0x4a   : > { %v524_v5 = vand.u32 2147483647, %v508_v45  ;;  %v525_v6 = vand.u32 2147483647, %v509_v46  ;;  %vm411_vm2 = vcmp.lt.s32.totalorder %v1218_v26, %v1206_v19  ;;  %vm412_vm3 = vcmp.lt.s32.totalorder %v1224_v30, %v1206_v19  ;;  %v452_v38 = vld [vmem:[%s1185_s0 + $0x48] sm:$0xff]  ;;  %v453_v39 = vld [vmem:[%s1185_s0 + $0x50] sm:$0xff] }
  0x4b   : > { %vm413_vm4 = vcmp.lt.s32.totalorder %v1227_v31, %v1206_v19  ;;  %vm414_vm5 = vcmp.lt.s32.totalorder %v1230_v32, %v1206_v19  ;;  %v464_v11 = vsub.f32 %v448_v52, %v432_v51  ;;  %v478_v12 = vand.u32 2147483647, %v462_v58  ;;  %v500_v46 = vld [vmem:[%s1190_s24 + $0x48] sm:$0xff]  ;;  %v501_v53 = vld [vmem:[%s1190_s24 + $0x50] sm:$0xff]  ;;  %v438_v26 = vld [vmem:[%s1195_s23 + $0x58] sm:$0xff] }
  0x4c   : > { %v512_v13 = vsub.f32 %v496_v59, %v432_v51  ;;  %v526_v14 = vand.u32 2147483647, %v510_v61  ;;  %vm415_vm6 = vcmp.lt.s32.totalorder %v1233_v33, %v1206_v19  ;;  %v465_v15 = vsub.f32 %v449_v57, %v433_v56 }
  0x4d   : > { %v479_v16 = vand.u32 2147483647, %v463_v62  ;;  %v513_v18 = vsub.f32 %v497_v60, %v433_v56  ;;  %v527_v21 = vand.u32 2147483647, %v511_v2  ;;  %v539_v22 = vadd.f32 %v523_v3, %v475_v63 }
  0x4e   : > { %v540_v27 = vadd.f32 %v524_v5, %v476_v0  ;;  %v541_v28 = vadd.f32 %v525_v6, %v477_v1  ;;  %vm416_vm7 = vcmp.lt.s32.totalorder %v1236_v34, %v1206_v19  ;;  %vm417_vm8 = vcmp.lt.s32.totalorder %v1242_v41, %v1206_v19  ;;  %v454_v0 = vld [vmem:[%s1185_s0 + $0x58] sm:$0xff] }
  0x4f   : > { %v466_v36 = vsub.f32 %v450_v9, %v434_v7  ;;  %v467_v37 = vsub.f32 %v451_v10, %v435_v8  ;;  %v480_v40 = vand.u32 2147483647, %v464_v11  ;;  %v514_v42 = vsub.f32 %v498_v17, %v434_v7  ;;  %v502_v1 = vld [vmem:[%s1190_s24 + $0x58] sm:$0xff]  ;;  %v439_v9 = vld [vmem:[%s1195_s23 + $0x60] sm:$0xff] }
  0x50   : > { %v528_v43 = vand.u32 2147483647, %v512_v13  ;;  %v542_v44 = vadd.f32 %v526_v14, %v478_v12  ;;  %vm418_vm9 = vcmp.lt.s32.totalorder %v1247_v47, %v1206_v19  ;;  %v481_v45 = vand.u32 2147483647, %v465_v15  ;;  %v455_v10 = vld [vmem:[%s1185_s0 + $0x60] sm:$0xff] }
  0x51   : > { %v515_v51 = vsub.f32 %v499_v20, %v435_v8  ;;  %v529_v52 = vand.u32 2147483647, %v513_v18  ;;  %v543_v56 = vadd.f32 %v527_v21, %v479_v16  ;;  %v556_v57 = vsel %vm411_vm2, %v539_v22, 0.0  ;;  %v503_v11 = vld [vmem:[%s1190_s24 + $0x60] sm:$0xff]  ;;  %v440_v20 = vld [vmem:[%s1195_s23 + $0x68] sm:$0xff] }
  0x52   : > { %v557_v58 = vsel %vm412_vm3, %v540_v27, 0.0  ;;  %v558_v59 = vsel %vm413_vm4, %v541_v28, 0.0  ;;  %vm419_vm10 = vcmp.lt.s32.totalorder %v1250_v48, %v1206_v19  ;;  %v468_v60 = vsub.f32 %v452_v38, %v436_v29  ;;  %v456_v21 = vld [vmem:[%s1185_s0 + $0x68] sm:$0xff] }
  0x53   : > { %v469_v61 = vsub.f32 %v453_v39, %v437_v35  ;;  %v482_v62 = vand.u32 2147483647, %v466_v36  ;;  %v483_v63 = vand.u32 2147483647, %v467_v37  ;;  %v516_v2 = vsub.f32 %v500_v46, %v436_v29  ;;  %v504_v22 = vld [vmem:[%s1190_s24 + $0x68] sm:$0xff]  ;;  %v441_v39 = vld [vmem:[%s1195_s23 + $0x70] sm:$0xff] }
  0x54   : > { %v530_v30 = vand.u32 2147483647, %v514_v42  ;;  %v544_v3 = vadd.f32 %v528_v43, %v480_v40  ;;  %v559_v31 = vsel %vm414_vm5, %v542_v44, 0.0  ;;  %vm420_vm11 = vcmp.lt.s32.totalorder %v1253_v49, %v1206_v19  ;;  %v457_v40 = vld [vmem:[%s1185_s0 + $0x70] sm:$0xff] }
  0x55   : > { %v517_v5 = vsub.f32 %v501_v53, %v437_v35  ;;  %v573_v6 = vsel %vm572_vm1, %v556_v57, 0.0  ;;  %v574_v7 = vsel %vm572_vm1, %v557_v58, 0.0  ;;  %v576_v8 = vsel %vm572_vm1, %v558_v59, 0.0  ;;  %v505_v42 = vld [vmem:[%s1190_s24 + $0x70] sm:$0xff]  ;;  %v458_v57 = vld [vmem:[%s1185_s0 + $0x78] sm:$0xff] }
  0x56   : > { %v531_v12 = vand.u32 2147483647, %v515_v51  ;;  %v545_v13 = vadd.f32 %v529_v52, %v481_v45  ;;  %v560_v32 = vsel %vm415_vm6, %v543_v56, 0.0  ;;  %v575_v14 = vadd.f32 %v574_v7, %v573_v6  ;;  %v442_v56 = vld [vmem:[%s1195_s23 + $0x78] sm:$0xff] }
  0x57   : > { %vm421_vm12 = vcmp.lt.s32.totalorder %v1256_v50, %v1206_v19  ;;  %v470_v15 = vsub.f32 %v454_v0, %v438_v26  ;;  %v484_v16 = vand.u32 2147483647, %v468_v60  ;;  %v518_v17 = vsub.f32 %v502_v1, %v438_v26  ;;  %v506_v58 = vld [vmem:[%s1190_s24 + $0x78] sm:$0xff] }
  0x58   : > { %v578_v18 = vsel %vm572_vm1, %v559_v31, 0.0  ;;  %v532_v27 = vand.u32 2147483647, %v516_v2  ;;  %v546_v28 = vadd.f32 %v530_v30, %v482_v62  ;;  %v561_v33 = vsel %vm416_vm7, %v544_v3, 0.0 }
  0x59   : > { %v577_v29 = vadd.f32 %v576_v8, %v575_v14  ;;  %v471_v35 = vsub.f32 %v455_v10, %v439_v9  ;;  %v485_v36 = vand.u32 2147483647, %v469_v61  ;;  %v519_v37 = vsub.f32 %v503_v11, %v439_v9 }
  0x5a   : > { %v580_v38 = vsel %vm572_vm1, %v560_v32, 0.0  ;;  %v533_v43 = vand.u32 2147483647, %v517_v5  ;;  %v547_v44 = vadd.f32 %v531_v12, %v483_v63  ;;  %v562_v45 = vsel %vm417_vm8, %v545_v13, 0.0 }
  0x5b   : > { %v579_v34 = vadd.f32 %v578_v18, %v577_v29  ;;  %v472_v46 = vsub.f32 %v456_v21, %v440_v20  ;;  %v486_v51 = vand.u32 2147483647, %v470_v15  ;;  %v520_v52 = vsub.f32 %v504_v22, %v440_v20 }
  0x5c   : > { %v582_v53 = vsel %vm572_vm1, %v561_v33, 0.0  ;;  %v534_v59 = vand.u32 2147483647, %v518_v17  ;;  %v548_v60 = vadd.f32 %v532_v27, %v484_v16  ;;  %v563_v61 = vsel %vm418_vm9, %v546_v28, 0.0 }
  0x5d   : > { %v581_v62 = vadd.f32 %v580_v38, %v579_v34  ;;  %v473_v63 = vsub.f32 %v457_v40, %v441_v39  ;;  %v487_v26 = vand.u32 2147483647, %v471_v35  ;;  %v521_v41 = vsub.f32 %v505_v42, %v441_v39 }
  0x5e   : > { %v584_v0 = vsel %vm572_vm1, %v562_v45, 0.0  ;;  %v535_v1 = vand.u32 2147483647, %v519_v37  ;;  %v549_v2 = vadd.f32 %v533_v43, %v485_v36  ;;  %v564_v30 = vsel %vm419_vm10, %v547_v44, 0.0 }
  0x5f   : > { %v583_v3 = vadd.f32 %v582_v53, %v581_v62  ;;  %v474_v31 = vsub.f32 %v458_v57, %v442_v56  ;;  %v488_v5 = vand.u32 2147483647, %v472_v46  ;;  %v522_v6 = vsub.f32 %v506_v58, %v442_v56 }
  0x60   : > { %v586_v7 = vsel %vm572_vm1, %v563_v61, 0.0  ;;  %v536_v47 = vand.u32 2147483647, %v520_v52  ;;  %v550_v8 = vadd.f32 %v534_v59, %v486_v51  ;;  %v565_v9 = vsel %vm420_vm11, %v548_v60, 0.0  ;;  %v555_v52 = vld [vmem:[#allocation2] sm:$0x1] }
  0x61   : > { %v585_v10 = vadd.f32 %v584_v0, %v583_v3  ;;  %v407_v11 = vadd.s32 %v1200_v4, %v1211_v23  ;;  %vm422_vm13 = vcmp.lt.s32.totalorder %v1262_v54, %v1206_v19  ;;  %v489_v48 = vand.u32 2147483647, %v473_v63 }
  0x62   : > { %v588_v12 = vsel %vm572_vm1, %v564_v30, 0.0  ;;  %v537_v13 = vand.u32 2147483647, %v521_v41  ;;  %v551_v32 = vadd.f32 %v535_v1, %v487_v26  ;;  %v566_v14 = vsel %vm421_vm12, %v549_v2, 0.0 }
  0x63   : > { %v587_v15 = vadd.f32 %v586_v7, %v585_v10  ;;  %v408_v49 = vadd.s32 %v1200_v4, %v1213_v24  ;;  %vm423_vm14 = vcmp.lt.s32.totalorder %v1265_v55, %v1206_v19  ;;  %v490_v23 = vand.u32 2147483647, %v474_v31 }
  0x64   : > { %v590_v16 = vsel %vm572_vm1, %v565_v9, 0.0  ;;  %v538_v54 = vand.u32 2147483647, %v522_v6  ;;  %v552_v17 = vadd.f32 %v536_v47, %v488_v5  ;;  %v567_v18 = vsel %vm422_vm13, %v550_v8, 0.0 }
  0x65   : > { %v589_v20 = vadd.f32 %v588_v12, %v587_v15  ;;  %v409_v21 = vadd.s32 %v1200_v4, %v1215_v25  ;;  %vm424_vm15 = vcmp.lt.s32.totalorder %v407_v11, %v1206_v19  ;;  %v592_v50 = vsel %vm572_vm1, %v566_v14, 0.0 }
  0x66   : > { %v553_v22 = vadd.f32 %v537_v13, %v489_v48  ;;  %v568_v27 = vsel %vm423_vm14, %v551_v32, 0.0  ;;  %vm425_vm0 = vcmp.lt.s32.totalorder %v408_v49, %v1206_v19  ;;  %v594_v55 = vsel %vm572_vm1, %v567_v18, 0.0 }
  0x67   : > { %v591_v24 = vadd.f32 %v590_v16, %v589_v20  ;;  %v554_v28 = vadd.f32 %v538_v54, %v490_v23  ;;  %v569_v33 = vsel %vm424_vm15, %v552_v17, 0.0  ;;  %vm426_vm2 = vcmp.lt.s32.totalorder %v409_v21, %v1206_v19 }
  0x68   : > { %v596_v35 = vsel %vm572_vm1, %v568_v27, 0.0  ;;  %v570_v36 = vsel %vm425_vm0, %v553_v22, 0.0  ;;  %v598_v25 = vsel %vm572_vm1, %v569_v33, 0.0  ;;  %vm611_vm3 = vcmask 647168  }
  0x69   : > { %v593_v29 = vadd.f32 %v592_v50, %v591_v24  ;;  %v571_v37 = vsel %vm426_vm2, %v554_v28, 0.0  ;;  %v600_v39 = vsel %vm572_vm1, %v570_v36, 0.0 }
  0x6a   : > { %v602_v42 = vsel %vm572_vm1, %v571_v37, 0.0 }
  0x6b   : > { %v595_v4 = vadd.f32 %v594_v55, %v593_v29 }
  0x6d   : > { %v597_v38 = vadd.f32 %v596_v35, %v595_v4 }
  0x6f   : > { %v599_v40 = vadd.f32 %v598_v25, %v597_v38 }
  0x71   : > { %v601_v43 = vadd.f32 %v600_v39, %v599_v40 }
  0x73   : > { %v603_v44 = vadd.f32 %v602_v42, %v601_v43 }
  0x75   : > { %v604_v45 = vrot.slane %v603_v44, 4 }
  0x77   : > { %v605_v34 = vadd.f32 %v604_v45, %v603_v44 }
  0x79   : > { %v606_v46 = vrot.slane %v605_v34, 2 }
  0x7b   : > { %v607_v51 = vadd.f32 %v606_v46, %v605_v34 }
  0x7d   : > { %v608_v19 = vrot.slane %v607_v51, 1 }
  0x7f   : > { %v609_v53 = vadd.f32 %v608_v19, %v607_v51 }
  0x81   : > { %v610_v56 = vadd.f32 %v609_v53, %v555_v52 }
  0x83   : > { %612 = vst.msk [vmem:[#allocation2] sm:$0x1] %vm611_vm3, %v610_v56 }
  0x84 PF: > { %p855_p7 = scmp.ne.s32.totalorder %s1032_s28, 2 }
  0x86   : > { %616 = sbr.rel (%p855_p7) target bundleno = 402 (0x192), region = 52 }
  0x8b   : > { %v617_v57 = vld [vmem:[%s1171_s9] sm:$0x7]  ;;  %v620_v0 = vlaneseq  ;;  %v626_v14 = vstv %s1179_s18  ;;  %vm655_vm6 = vcmask 1042432   ;;  %vm667_vm7 = vcmask 647168  }
  0x8c   : > { %v628_v58 = vsub.f32 0.0, %v617_v57  ;;  %v618_v2 = vld [vmem:[%s1176_s16] sm:$0x7] }
  0x8d   : > { %v621_v3 = vshrl.u32 %v620_v0, 7  ;;  %v619_v31 = vcvt.s32.f32 %v618_v2  ;;  %v623_v8 = vand.u32 127, %v620_v0  ;;  %v666_v17 = vld [vmem:[#allocation2] sm:$0x1] }
  0x8e   : > { %v630_v59 = vsub.f32 0.0, %v628_v58  ;;  %v629_v7 = vmax.f32 %v628_v58, 0.0  ;;  %v668_v20 = vsel %vm667_vm7, %v666_v17, 0.0 }
  0x8f   : > { %v624_v9 = vmul.u32 128, %v621_v3  ;;  %v648_v11 = vmul.f32 5.0, %v619_v31  ;;  %v650_v12 = vsub.f32 1.0, %v619_v31  ;;  %vm678_vm8 = vcmp.eq.s32.totalorder %v621_v3, 0 }
  0x90   : > { %v633_v60 = vand.u32 2147483647, %v630_v59  ;;  %vm631_vm4 = vcmp.ne.f32.partialorder %v630_v59, %v630_v59  ;;  %vm679_vm9 = vcmp.eq.s32.totalorder %v623_v8, 0  ;;  %vm683_vm10 = vcmp.eq.s32.totalorder %v623_v8, 1 }
  0x91   : > { %v625_v13 = vadd.s32 %v624_v9, %v623_v8  ;;  %vm680_vm11 = vmand %vm678_vm8, %vm679_vm9 }
  0x92   : > { %v634_v61 = vsub.f32 0.0, %v633_v60  ;;  %vm684_vm12 = vmand %vm678_vm8, %vm683_vm10 }
  0x93   : > { %vm627_vm5 = vcmp.lt.s32.totalorder %v625_v13, %v626_v14 }
  0x94   : > { %v635_v62 = vmul.f32 1.442695, %v634_v61 }
  0x96   : > { %938 = vpow2.f32 %v635_v62 }
  0xa3   : > { %v939_v63 = vpop.eup %938 }
  0xa4   : > { %v637_v26 = vadd.f32 1.0, %v939_v63  ;;  %v640_v41 = vmul.f32 -0.5, %v939_v63  ;;  %v643_v30 = vand.u32 2147483647, %v939_v63 }
  0xa6   : > { %940 = vlog2.f32 %v637_v26  ;;  %v641_v1 = vadd.f32 1.0, %v640_v41  ;;  %vm644_vm1 = vcmp.lt.f32.partialorder %v643_v30, 0.0004427343 }
  0xa8   : > { %v642_v5 = vmul.f32 %v939_v63, %v641_v1 }
  0xb3   : > { %v941_v6 = vpop.eup %940 }
  0xb4   : > { %v639_v47 = vmul.f32 0.6931472, %v941_v6 }
  0xb6   : > { %v645_v10 = vsel %vm644_vm1, %v642_v5, %v639_v47 }
  0xb7   : > { %v646_v48 = vadd.f32 %v645_v10, %v629_v7 }
  0xb9   : > { %v647_v32 = vsel %vm631_vm4, %v628_v58, %v646_v48 }
  0xba   : > { %v649_v15 = vmul.f32 %v648_v11, %v647_v32  ;;  %v651_v49 = vadd.f32 %v647_v32, %v617_v57 }
  0xbc   : > { %v652_v23 = vmul.f32 %v651_v49, %v650_v12 }
  0xbe   : > { %v653_v16 = vadd.f32 %v652_v23, %v649_v15 }
  0xc0   : > { %v654_v54 = vsel %vm627_vm5, %v653_v16, 0.0 }
  0xc1   : > { %v656_v18 = vsel %vm655_vm6, %v654_v54, 0.0 }
  0xc2   : > { %657 = vadd.xlane.f32.xlu0 %v656_v18 }
  0xc6   : > { %669 = vadd.xlane.f32.xlu0 %v668_v20 }
 0x14b   : > { %v658_v21 = vpop.xlane.xlu0 %657 }
 0x14c   : > { %v659_v50 = vrot.slane %v658_v21, 4 }
 0x14e   : > { %v660_v22 = vadd.f32 %v659_v50, %v658_v21 }
 0x14f   : > { %v670_v27 = vpop.xlane.xlu0 %669 }
 0x150   : > { %v661_v24 = vrot.slane %v660_v22, 2  ;;  %v671_v55 = vrot.slane %v670_v27, 4 }
 0x152   : > { %v672_v28 = vadd.f32 %v671_v55, %v670_v27  ;;  %v662_v33 = vadd.f32 %v661_v24, %v660_v22 }
 0x154   : > { %v673_v29 = vrot.slane %v672_v28, 2  ;;  %v663_v35 = vrot.slane %v662_v33, 1 }
 0x156   : > { %v674_v36 = vadd.f32 %v673_v29, %v672_v28  ;;  %v664_v4 = vadd.f32 %v663_v35, %v662_v33 }
 0x158   : > { %861 = vpush %v664_v4  ;;  %v675_v25 = vrot.slane %v674_v36, 1 }
 0x15a   : > { %v676_v37 = vadd.f32 %v675_v25, %v674_v36 }
 0x15c   : > { %863 = vpush %v676_v37 }
 0x189   : > { %s862_s4 = spop %861 }
 0x18a   : > { %v685_v39 = vstv %s862_s4 }
 0x18d   : > { %s864_s0 = spop %863 }
 0x18e   : > { %v681_v38 = vstv %s864_s0 }
 0x18f   : > { %v682_v40 = vsel %vm680_vm11, %v681_v38, 0.0 }
 0x190   : > { %v686_v42 = vsel %vm684_vm12, %v685_v39, %v682_v40 }
 0x191   : > { %687 = vst [vmem:[%s325_s19] sm:$0xff] %v686_v42 }
 0x192 PF: > { %s857_s28 = sshll.u32 %s1036_s29, 7  ;;  %s702_s12 = sshll.u32 %s325_s19, 4  ;;  %s703_s12 = int_to_ptr.vmem [resolvable:$true] %s702_s12 }
 0x193   : > { %s700_s11 = scalar_lea.hbm %s1442_s6, %s857_s28  ;;  %s1460_s14 = sand.u32 1, %s1024_s27  }
 0x194   : > { %s689_s17 = scalar_lea.sflag [#allocation6], %s1460_s14  ;;  %s954_s18 = scalar_lea.vmem %s703_s12, 128 }
 0x195   : > { %p955_p9 = scmp.ne.s32.totalorder %s703_s12, %s954_s18  ;;  %s1052_s22 = smov [#allocation5]  }
 0x196   : > { %s958_s9 = sshll.u32 %s1052_s22, 4  ;;  %s959_s9 = int_to_ptr.vmem [resolvable:$false] %s958_s9 }
 0x197   : > { %p956_p10 = pnand %p955_p9, %p1140_p8  ;;  %s960_s10 = scalar_lea.vmem %s959_s9, 256 }
 0x198   : > { %p961_p12 = scmp.lt.s32.totalorder %s703_s12, %s959_s9  ;;  %p962_p13 = scmp.lt.s32.totalorder %s960_s10, %s954_s18 }
 0x199   : > { %p957_p11 = pneg %p956_p10 }
 0x19a   : > { %p963_p1 = por %p962_p13, %p961_p12 }
 0x19c   : > { %p964_p2 = pnand %p963_p1, %p957_p11 }
 0x19e   : > { %967 = shalt.err (!%p964_p2)
}
 0x19f   : > { %s968_s29 = scalar_lea.hbm %s700_s11, 128  ;;  %s972_s16 = scalar_lea.hbm %s1442_s6, 256 }
 0x1a0   : > { %p969_p3 = scmp.ne.s32.totalorder %s700_s11, %s968_s29  ;;  %p973_p6 = scmp.lt.s32.totalorder %s700_s11, %s1442_s6 }
 0x1a1   : > { %p974_p7 = scmp.lt.s32.totalorder %s972_s16, %s968_s29 }
 0x1a2   : > { %p970_p4 = pnand %p969_p3, %p1140_p8 }
 0x1a3   : > { %p975_p9 = por %p974_p7, %p973_p6 }
 0x1a4   : > { %p971_p5 = pneg %p970_p4 }
 0x1a6   : > { %p976_p10 = pnand %p975_p9, %p971_p5 }
 0x1a8   : > { %979 = shalt.err (!%p976_p10)
}
 0x1a9   : > { %865 = dma.vmem_to_hbm [thread:$0]  (%p1140_p8), %s703_s12, 128, %s700_s11, %s689_s17  }
 0x1aa PF: > { %p871_p11 = scmp.ge.s32.totalorder %s1048_s8, 2  ;;  %s714_s23 = sand.u32 1, %s1020_s26  }
 0x1ab   : > { %s715_s19 = scalar_lea.sflag [#allocation6], %s714_s23 }
 0x1ac   : > { %p868_p12 = pnand %p871_p11, %p1150_p0 }
 0x1ae   : > { %p869_p13 = pneg %p868_p12 }
 0x1b0   : > { %1015 = dma.done.wait (%p869_p13), %s715_s19, 128  }
 0x1b1   : > { %1017 = vsyncadd (%p869_p13), %s715_s19, 4294967168  ;;  %s25_s8 = sadd.s32 1, %s1048_s8   ;;  %s1462_s4 = sld [smem:[#allocation9_spill]] }
 0x1b2   : > { %p22_p1 = scmp.ge.s32.totalorder %s25_s8, 8   ;;  %s1463_s0 = sld [smem:[#allocation15_spill]] }
 0x1b3   : > { %s1464_s28 = sld [smem:[#allocation10_spill]]  ;;  %s1468_s26 = smov %s1024_s27 }
 0x1b4   : > { %s1465_s29 = sld [smem:[#allocation11_spill]]  ;;  %24 = sbr.rel (!%p22_p1) target bundleno = 20 (0x14), region = 99 }
 0x1b5   : > { %s1466_s30 = sld [smem:[#allocation12_spill]] }
 0x1b6   : > { %s1467_s7 = sld [smem:[#allocation13_spill]] }
 0x1b7   : > { %s1469_s27 = smov %s1462_s4 }
 0x1b9   :  { %720 = vsyncpa [#allocation6], 1 }
 0x1ba   :  { %722 = vsyncpa [#allocation6 + $0x1], 1 }

</bundles_post_ra>
